<compile_context>
chip_gen: v6e
topology: v6e:2x2x1
jax: 0.10.0
libtpu: 0.0.40
codegen_flags: <defaults>
</compile_context>

<pallas_src>
import jax
import jax.numpy as jnp
from jax.experimental import pallas as pl
from jax.experimental.pallas import tpu as pltpu


def _dma_copy_kernel(x_hbm, o_hbm, sem):
    # Single direct HBM->HBM DMA: no VMEM staging, no in-kernel vld/vst pass.
    cp = pltpu.make_async_copy(x_hbm, o_hbm, sem)
    cp.start()
    cp.wait()


def _materialized_identity(x: jax.Array) -> jax.Array:
    """Bit-exact copy of `x` into a fresh buffer via one HBM->HBM DMA."""
    nbytes = x.size * x.dtype.itemsize
    return pl.pallas_call(
        _dma_copy_kernel,
        out_shape=jax.ShapeDtypeStruct(x.shape, x.dtype),
        in_specs=[pl.BlockSpec(memory_space=pl.ANY)],
        out_specs=pl.BlockSpec(memory_space=pl.ANY),
        scratch_shapes=[pltpu.SemaphoreType.DMA(())],
        cost_estimate=pl.CostEstimate(
            flops=0, transcendentals=0, bytes_accessed=2 * nbytes
        ),
    )(x)


def print_forward(x: jax.Array, *, materialize: bool = False) -> jax.Array:
    """Equivalent of the torch module: print(x.size()); return x."""
    # TODO(synk): this fires at trace time, so under jit it prints once per
    # compilation rather than once per call (PyTorch eager prints every call).
    print(tuple(x.shape))

    if not materialize:
        # Fastest correct implementation on v5e/v6e/v7x: identity, never
        # touch HBM.  (Callers needing a distinct buffer pass materialize=True.)
        return x

    return _materialized_identity(x)


if __name__ == "__main__":
    key = jax.random.PRNGKey(0)
    k1, k2 = jax.random.split(key)

    # Module's example input: torch.randn(1, 25).
    x_small = jax.random.normal(k1, (1, 25), dtype=jnp.float32)

    # Default path: pure identity pass-through (no data movement).
    y_small = jax.block_until_ready(print_forward(x_small))
    assert y_small.shape == x_small.shape and y_small.dtype == x_small.dtype
    assert bool(jnp.all(y_small == x_small))

    # Exercise the Pallas HBM->HBM DMA copy path once on the module's input.
    y_small_copy = jax.block_until_ready(print_forward(x_small, materialize=True))
    assert y_small_copy.shape == x_small.shape
    assert y_small_copy.dtype == x_small.dtype
    assert bool(jnp.all(y_small_copy == x_small))

    # And once on a small lane-dense input to confirm the same kernel handles
    # larger aligned shapes bit-exactly.
    x_large = jax.random.normal(k2, (256, 256), dtype=jnp.float32)
    y_large = jax.block_until_ready(print_forward(x_large, materialize=True))
    assert y_large.shape == x_large.shape and y_large.dtype == x_large.dtype
    assert bool(jnp.all(y_large == x_large))

    print("KERNEL_OK")
</pallas_src>

<mosaic_0001>
module attributes {stable_mosaic.version = 11 : i64} {
  func.func @_dma_copy_kernel(%arg0: memref<1x25xf32, #tpu.memory_space<any>>, %arg1: memref<1x25xf32, #tpu.memory_space<any>>, %arg2: memref<!tpu.dma_semaphore, #tpu.memory_space<semaphore_mem>>) attributes {dimension_semantics = [], scalar_prefetch = 0 : i64, scratch_operands = 1 : i64, tpu.core_type = #tpu.core_type<tc>} {
    tpu.enqueue_dma source(%arg0 : memref<1x25xf32, #tpu.memory_space<any>>) target(%arg1 : memref<1x25xf32, #tpu.memory_space<any>>) target_semaphore(%arg2 : memref<!tpu.dma_semaphore, #tpu.memory_space<semaphore_mem>>)
    tpu.wait_dma2 semaphore(%arg2 : memref<!tpu.dma_semaphore, #tpu.memory_space<semaphore_mem>>) src(%arg0 : memref<1x25xf32, #tpu.memory_space<any>>) dst(%arg1 : memref<1x25xf32, #tpu.memory_space<any>>)
    return
  }
}

</mosaic_0001>

<bundles_post_ra>
// kernel: tpu_custom_call.1
= control target key start
LH: loop header
LB: loop body
LE: loop exit
PB: predicated region body
PF: predicated region fallthrough
CT: control target
= control target key end

     0   :  { %s28_s6 = smov [#allocation2]   ;;  %s29_s7 = smov 131072   ;;  %s47_s0 = inlined_call_operand.hbm [shape: f32[1,25], index: 0, kind: input, shape index: {}]   ;;  %s48_s1 = inlined_call_operand.hbm [shape: f32[1,25], index: 1, kind: output, shape index: {}]  }
   0x1   :  { %s30_s8 = smov 0  }
   0x2   :  { %12 = dma.general %s47_s0, 16, %s48_s1, %s28_s6, %s29_s7, [#allocation4], %s30_s8, 0  }
   0x3   :  { %26 = dma.done.wait [#allocation2], 16 }
   0x4   :  { %27 = vsyncadd [#allocation2], 4294967280 }
   0x5   :  { %16 = vsyncmov [#allocation2] }
   0x8   :  { %s17_s13 = vpop.sfrf %16 }
   0x9   :  { %p22_p0 = scmp.ne.s32.totalorder %s17_s13, 0 }
   0xb   :  { %21 = shalt.err (%p22_p0)  }

</bundles_post_ra>
